<compile_context>
chip_gen: v7x
topology: tpu7x:2x2x1
jax: 0.10.0
libtpu: 0.0.40
codegen_flags: <defaults>
</compile_context>

<pallas_src>
import jax
import jax.numpy as jnp
from jax.experimental import pallas as pl
from jax.experimental.pallas import tpu as pltpu


def _round_up(n, m):
    return ((n + m - 1) // m) * m


_PARAM_ORDER = ("w1", "b1", "w2", "b2", "w3", "b3",
                "w4", "b4", "w5", "b5", "w6", "b6")


def _autoencoder_kernel(x_ref,
                        w1, b1, w2, b2, w3, b3,   # encoder params
                        w4, b4, w5, b5, w6, b6,   # decoder params
                        recon_ref, z_ref):
    # bf16 matmul inputs (MXU fast path), f32 accumulate / bias add / ReLU.
    x = x_ref[...].astype(jnp.bfloat16)

    # ---- encoder ----
    h = jnp.dot(x, w1[...], preferred_element_type=jnp.float32) + b1[...]
    h = jnp.maximum(h, 0.0).astype(jnp.bfloat16)
    h = jnp.dot(h, w2[...], preferred_element_type=jnp.float32) + b2[...]
    h = jnp.maximum(h, 0.0).astype(jnp.bfloat16)
    z = jnp.dot(h, w3[...], preferred_element_type=jnp.float32) + b3[...]
    z_ref[...] = z.astype(z_ref.dtype)

    # ---- decoder ----
    h = jnp.dot(z.astype(jnp.bfloat16), w4[...],
                preferred_element_type=jnp.float32) + b4[...]
    h = jnp.maximum(h, 0.0).astype(jnp.bfloat16)
    h = jnp.dot(h, w5[...], preferred_element_type=jnp.float32) + b5[...]
    h = jnp.maximum(h, 0.0).astype(jnp.bfloat16)
    recon = jnp.dot(h, w6[...], preferred_element_type=jnp.float32) + b6[...]
    recon_ref[...] = recon.astype(recon_ref.dtype)


def prepare_params(params):
    """Weights -> bf16 (MXU input dtype), biases -> f32 (VPU add dtype)."""
    prepared = {}
    for name in _PARAM_ORDER:
        arr = params[name]
        prepared[name] = arr.astype(jnp.bfloat16 if name.startswith("w")
                                    else jnp.float32)
    return prepared


def _pick_batch_tile(B, batch_tile):
    """Batch tile: large (multiple of 256) to amortize per-step overhead,
    but capped so the grid has >= 2 steps once B > 256 (v7x megacore)."""
    if B <= 256:
        return B                       # single full-array block (always legal)
    half = _round_up(pl.cdiv(B, 2), 256)
    return min(_round_up(batch_tile, 256), half)


def jockey_autoencoder_forward(x, params, *, batch_tile=1024,
                               out_dtype=jnp.float32,
                               vmem_limit_bytes=32 * 1024 * 1024):
    """x: (B, input_dim). params: dict of (in,out) weights and (1,out) biases.

    Returns (x_recon, z) with the same semantics as the PyTorch module.
    """
    B, D = x.shape
    L = params["w3"].shape[1]
    prepared = prepare_params(params)

    tb = _pick_batch_tile(B, batch_tile)
    grid = (pl.cdiv(B, tb),)

    if x.dtype != jnp.float32:
        x = x.astype(jnp.float32)

    # Advisory cost for XLA's scheduler (fused 6-matmul MLP, real byte counts).
    flops = 2 * B * (D * 512 + 512 * 128 + 128 * L
                     + L * 128 + 128 * 512 + 512 * D)
    param_bytes = sum(int(v.size) * v.dtype.itemsize for v in prepared.values())
    out_itemsize = jnp.dtype(out_dtype).itemsize
    bytes_accessed = (B * D * x.dtype.itemsize      # x read
                      + B * D * out_itemsize        # recon write
                      + B * L * out_itemsize        # z write
                      + param_bytes)                # resident params
    cost = pl.CostEstimate(flops=flops, transcendentals=0,
                           bytes_accessed=bytes_accessed)

    # Input / output specs. Feature (D) and latent (L) dims are full-array
    # width, so the (8,128) tiling rule is satisfied without padding.
    in_specs = [pl.BlockSpec((tb, D), lambda i: (i, 0))]
    for name in _PARAM_ORDER:
        in_specs.append(pl.BlockSpec(prepared[name].shape, lambda i: (0, 0)))
    out_specs = (pl.BlockSpec((tb, D), lambda i: (i, 0)),
                 pl.BlockSpec((tb, L), lambda i: (i, 0)))

    call = pl.pallas_call(
        _autoencoder_kernel,
        out_shape=(jax.ShapeDtypeStruct((B, D), out_dtype),
                   jax.ShapeDtypeStruct((B, L), out_dtype)),
        grid=grid,
        in_specs=in_specs,
        out_specs=out_specs,
        compiler_params=pltpu.CompilerParams(
            dimension_semantics=("parallel",),
            vmem_limit_bytes=vmem_limit_bytes),
        cost_estimate=cost,
    )
    recon, z = call(x, *(prepared[n] for n in _PARAM_ORDER))
    return recon, z


def init_params(key, input_dim, latent_dim=50):
    """Deterministic synthetic init (torch-equivalent bounds, stored (in,out))."""
    dims = [(input_dim, 512), (512, 128), (128, latent_dim),      # encoder
            (latent_dim, 128), (128, 512), (512, input_dim)]      # decoder
    params = {}
    for idx, (fan_in, fan_out) in enumerate(dims, start=1):
        key, kw, kb = jax.random.split(key, 3)
        bound = 1.0 / jnp.sqrt(fan_in)
        params[f"w{idx}"] = jax.random.uniform(
            kw, (fan_in, fan_out), jnp.float32, -bound, bound)
        params[f"b{idx}"] = jax.random.uniform(
            kb, (1, fan_out), jnp.float32, -bound, bound)
    return params


def _reference_forward(x, p):
    """Plain-JAX f32 reference for correctness checking."""
    h = jnp.maximum(x @ p["w1"] + p["b1"], 0.0)
    h = jnp.maximum(h @ p["w2"] + p["b2"], 0.0)
    z = h @ p["w3"] + p["b3"]
    h = jnp.maximum(z @ p["w4"] + p["b4"], 0.0)
    h = jnp.maximum(h @ p["w5"] + p["b5"], 0.0)
    recon = h @ p["w6"] + p["b6"]
    return recon, z


if __name__ == "__main__":
    key = jax.random.PRNGKey(0)
    INPUT_DIM, LATENT_DIM = 64, 50
    k_x, k_x2, k_p = jax.random.split(key, 3)
    params = init_params(k_p, INPUT_DIM, LATENT_DIM)

    # --- small single-tile case ---
    B = 8
    x = jax.random.normal(k_x, (B, INPUT_DIM), jnp.float32)
    recon, z = jockey_autoencoder_forward(x, params)
    recon = jax.block_until_ready(recon)
    z = jax.block_until_ready(z)
    recon_ref, z_ref = _reference_forward(x, params)
    assert recon.shape == (B, INPUT_DIM) and z.shape == (B, LATENT_DIM)
    # bf16 matmul inputs (f32 accumulation) vs. the f32 reference -> loose tol.
    assert jnp.allclose(recon, recon_ref, atol=7e-2, rtol=7e-2), \
        float(jnp.max(jnp.abs(recon - recon_ref)))
    assert jnp.allclose(z, z_ref, atol=7e-2, rtol=7e-2), \
        float(jnp.max(jnp.abs(z - z_ref)))

    # --- multi-step grid with a partial (masked) last batch block ---
    B2 = 300                          # tb=256 -> grid=(2,), last block is ragged
    x2 = jax.random.normal(k_x2, (B2, INPUT_DIM), jnp.float32)
    recon2, z2 = jockey_autoencoder_forward(x2, params)
    recon2 = jax.block_until_ready(recon2)
    z2 = jax.block_until_ready(z2)
    recon2_ref, z2_ref = _reference_forward(x2, params)
    assert recon2.shape == (B2, INPUT_DIM) and z2.shape == (B2, LATENT_DIM)
    assert jnp.allclose(recon2, recon2_ref, atol=7e-2, rtol=7e-2), \
        float(jnp.max(jnp.abs(recon2 - recon2_ref)))
    assert jnp.allclose(z2, z2_ref, atol=7e-2, rtol=7e-2), \
        float(jnp.max(jnp.abs(z2 - z2_ref)))

    print("KERNEL_OK")
</pallas_src>

<mosaic_0001>
module attributes {stable_mosaic.version = 11 : i64} {
  func.func @_autoencoder_kernel(%arg0: i32, %arg1: memref<8x64xf32, #tpu.memory_space<vmem>>, %arg2: memref<64x512xbf16, #tpu.memory_space<vmem>>, %arg3: memref<1x512xf32, #tpu.memory_space<vmem>>, %arg4: memref<512x128xbf16, #tpu.memory_space<vmem>>, %arg5: memref<1x128xf32, #tpu.memory_space<vmem>>, %arg6: memref<128x50xbf16, #tpu.memory_space<vmem>>, %arg7: memref<1x50xf32, #tpu.memory_space<vmem>>, %arg8: memref<50x128xbf16, #tpu.memory_space<vmem>>, %arg9: memref<1x128xf32, #tpu.memory_space<vmem>>, %arg10: memref<128x512xbf16, #tpu.memory_space<vmem>>, %arg11: memref<1x512xf32, #tpu.memory_space<vmem>>, %arg12: memref<512x64xbf16, #tpu.memory_space<vmem>>, %arg13: memref<1x64xf32, #tpu.memory_space<vmem>>, %arg14: memref<8x64xf32, #tpu.memory_space<vmem>>, %arg15: memref<8x50xf32, #tpu.memory_space<vmem>>) attributes {dimension_semantics = [#tpu.dimension_semantics<parallel>], iteration_bounds = array<i64: 1>, scalar_prefetch = 0 : i64, scratch_operands = 0 : i64, tpu.core_type = #tpu.core_type<tc>, window_params = [{transform_indices = @transform_0, window_bounds = array<i64: 8, 64>}, {pipeline_mode = #tpu.pipeline_mode<synchronous>, transform_indices = @transform_1, window_bounds = array<i64: 64, 512>}, {pipeline_mode = #tpu.pipeline_mode<synchronous>, transform_indices = @transform_2, window_bounds = array<i64: 1, 512>}, {pipeline_mode = #tpu.pipeline_mode<synchronous>, transform_indices = @transform_3, window_bounds = array<i64: 512, 128>}, {pipeline_mode = #tpu.pipeline_mode<synchronous>, transform_indices = @transform_4, window_bounds = array<i64: 1, 128>}, {pipeline_mode = #tpu.pipeline_mode<synchronous>, transform_indices = @transform_5, window_bounds = array<i64: 128, 50>}, {pipeline_mode = #tpu.pipeline_mode<synchronous>, transform_indices = @transform_6, window_bounds = array<i64: 1, 50>}, {pipeline_mode = #tpu.pipeline_mode<synchronous>, transform_indices = @transform_7, window_bounds = array<i64: 50, 128>}, {pipeline_mode = #tpu.pipeline_mode<synchronous>, transform_indices = @transform_8, window_bounds = array<i64: 1, 128>}, {pipeline_mode = #tpu.pipeline_mode<synchronous>, transform_indices = @transform_9, window_bounds = array<i64: 128, 512>}, {pipeline_mode = #tpu.pipeline_mode<synchronous>, transform_indices = @transform_10, window_bounds = array<i64: 1, 512>}, {pipeline_mode = #tpu.pipeline_mode<synchronous>, transform_indices = @transform_11, window_bounds = array<i64: 512, 64>}, {pipeline_mode = #tpu.pipeline_mode<synchronous>, transform_indices = @transform_12, window_bounds = array<i64: 1, 64>}, {transform_indices = @transform_13, window_bounds = array<i64: 8, 64>}, {transform_indices = @transform_14, window_bounds = array<i64: 8, 50>}]} {
    %c0 = arith.constant 0 : index
    %c0_0 = arith.constant 0 : index
    %0 = vector.load %arg1[%c0, %c0_0] : memref<8x64xf32, #tpu.memory_space<vmem>>, vector<8x64xf32>
    %1 = arith.truncf %0 : vector<8x64xf32> to vector<8x64xbf16>
    %c0_1 = arith.constant 0 : index
    %c0_2 = arith.constant 0 : index
    %2 = vector.load %arg2[%c0_1, %c0_2] : memref<64x512xbf16, #tpu.memory_space<vmem>>, vector<64x512xbf16>
    %cst = arith.constant dense<0.000000e+00> : vector<8x512xf32>
    %3 = tpu.matmul %1, %2, %cst {dimension_numbers = #tpu.dot_dimension_numbers<[1], [0], [0], [1], [0, 0, 1, 1], [], []>} : vector<8x64xbf16>, vector<64x512xbf16>, vector<8x512xf32> -> vector<8x512xf32>
    %c0_3 = arith.constant 0 : index
    %c0_4 = arith.constant 0 : index
    %4 = vector.load %arg3[%c0_3, %c0_4] : memref<1x512xf32, #tpu.memory_space<vmem>>, vector<1x512xf32>
    %5 = vector.broadcast %4 : vector<1x512xf32> to vector<8x512xf32>
    %6 = arith.addf %3, %5 : vector<8x512xf32>
    %cst_5 = arith.constant 0.000000e+00 : f32
    %7 = vector.broadcast %cst_5 : f32 to vector<8x512xf32>
    %8 = arith.maximumf %6, %7 : vector<8x512xf32>
    %9 = arith.truncf %8 : vector<8x512xf32> to vector<8x512xbf16>
    %c0_6 = arith.constant 0 : index
    %c0_7 = arith.constant 0 : index
    %10 = vector.load %arg4[%c0_6, %c0_7] : memref<512x128xbf16, #tpu.memory_space<vmem>>, vector<512x128xbf16>
    %cst_8 = arith.constant dense<0.000000e+00> : vector<8x128xf32>
    %11 = tpu.matmul %9, %10, %cst_8 {dimension_numbers = #tpu.dot_dimension_numbers<[1], [0], [0], [1], [0, 0, 1, 1], [], []>} : vector<8x512xbf16>, vector<512x128xbf16>, vector<8x128xf32> -> vector<8x128xf32>
    %c0_9 = arith.constant 0 : index
    %c0_10 = arith.constant 0 : index
    %12 = vector.load %arg5[%c0_9, %c0_10] : memref<1x128xf32, #tpu.memory_space<vmem>>, vector<1x128xf32>
    %13 = vector.broadcast %12 : vector<1x128xf32> to vector<8x128xf32>
    %14 = arith.addf %11, %13 : vector<8x128xf32>
    %cst_11 = arith.constant 0.000000e+00 : f32
    %15 = vector.broadcast %cst_11 : f32 to vector<8x128xf32>
    %16 = arith.maximumf %14, %15 : vector<8x128xf32>
    %17 = arith.truncf %16 : vector<8x128xf32> to vector<8x128xbf16>
    %c0_12 = arith.constant 0 : index
    %c0_13 = arith.constant 0 : index
    %18 = vector.load %arg6[%c0_12, %c0_13] : memref<128x50xbf16, #tpu.memory_space<vmem>>, vector<128x50xbf16>
    %cst_14 = arith.constant dense<0.000000e+00> : vector<8x50xf32>
    %19 = tpu.matmul %17, %18, %cst_14 {dimension_numbers = #tpu.dot_dimension_numbers<[1], [0], [0], [1], [0, 0, 1, 1], [], []>} : vector<8x128xbf16>, vector<128x50xbf16>, vector<8x50xf32> -> vector<8x50xf32>
    %c0_15 = arith.constant 0 : index
    %c0_16 = arith.constant 0 : index
    %20 = vector.load %arg7[%c0_15, %c0_16] : memref<1x50xf32, #tpu.memory_space<vmem>>, vector<1x50xf32>
    %21 = vector.broadcast %20 : vector<1x50xf32> to vector<8x50xf32>
    %22 = arith.addf %19, %21 : vector<8x50xf32>
    %c0_17 = arith.constant 0 : index
    %c0_18 = arith.constant 0 : index
    %23 = vector.load %arg15[%c0_17, %c0_18] : memref<8x50xf32, #tpu.memory_space<vmem>>, vector<8x50xf32>
    tpu.vector_store %arg15[%c0_17, %c0_18], %22 {strides = array<i32>} : memref<8x50xf32, #tpu.memory_space<vmem>>, vector<8x50xf32>,
    %24 = arith.truncf %22 : vector<8x50xf32> to vector<8x50xbf16>
    %c0_19 = arith.constant 0 : index
    %c0_20 = arith.constant 0 : index
    %25 = vector.load %arg8[%c0_19, %c0_20] : memref<50x128xbf16, #tpu.memory_space<vmem>>, vector<50x128xbf16>
    %cst_21 = arith.constant dense<0.000000e+00> : vector<8x128xf32>
    %26 = tpu.matmul %24, %25, %cst_21 {dimension_numbers = #tpu.dot_dimension_numbers<[1], [0], [0], [1], [0, 0, 1, 1], [], []>} : vector<8x50xbf16>, vector<50x128xbf16>, vector<8x128xf32> -> vector<8x128xf32>
    %c0_22 = arith.constant 0 : index
    %c0_23 = arith.constant 0 : index
    %27 = vector.load %arg9[%c0_22, %c0_23] : memref<1x128xf32, #tpu.memory_space<vmem>>, vector<1x128xf32>
    %28 = vector.broadcast %27 : vector<1x128xf32> to vector<8x128xf32>
    %29 = arith.addf %26, %28 : vector<8x128xf32>
    %cst_24 = arith.constant 0.000000e+00 : f32
    %30 = vector.broadcast %cst_24 : f32 to vector<8x128xf32>
    %31 = arith.maximumf %29, %30 : vector<8x128xf32>
    %32 = arith.truncf %31 : vector<8x128xf32> to vector<8x128xbf16>
    %c0_25 = arith.constant 0 : index
    %c0_26 = arith.constant 0 : index
    %33 = vector.load %arg10[%c0_25, %c0_26] : memref<128x512xbf16, #tpu.memory_space<vmem>>, vector<128x512xbf16>
    %cst_27 = arith.constant dense<0.000000e+00> : vector<8x512xf32>
    %34 = tpu.matmul %32, %33, %cst_27 {dimension_numbers = #tpu.dot_dimension_numbers<[1], [0], [0], [1], [0, 0, 1, 1], [], []>} : vector<8x128xbf16>, vector<128x512xbf16>, vector<8x512xf32> -> vector<8x512xf32>
    %c0_28 = arith.constant 0 : index
    %c0_29 = arith.constant 0 : index
    %35 = vector.load %arg11[%c0_28, %c0_29] : memref<1x512xf32, #tpu.memory_space<vmem>>, vector<1x512xf32>
    %36 = vector.broadcast %35 : vector<1x512xf32> to vector<8x512xf32>
    %37 = arith.addf %34, %36 : vector<8x512xf32>
    %cst_30 = arith.constant 0.000000e+00 : f32
    %38 = vector.broadcast %cst_30 : f32 to vector<8x512xf32>
    %39 = arith.maximumf %37, %38 : vector<8x512xf32>
    %40 = arith.truncf %39 : vector<8x512xf32> to vector<8x512xbf16>
    %c0_31 = arith.constant 0 : index
    %c0_32 = arith.constant 0 : index
    %41 = vector.load %arg12[%c0_31, %c0_32] : memref<512x64xbf16, #tpu.memory_space<vmem>>, vector<512x64xbf16>
    %cst_33 = arith.constant dense<0.000000e+00> : vector<8x64xf32>
    %42 = tpu.matmul %40, %41, %cst_33 {dimension_numbers = #tpu.dot_dimension_numbers<[1], [0], [0], [1], [0, 0, 1, 1], [], []>} : vector<8x512xbf16>, vector<512x64xbf16>, vector<8x64xf32> -> vector<8x64xf32>
    %c0_34 = arith.constant 0 : index
    %c0_35 = arith.constant 0 : index
    %43 = vector.load %arg13[%c0_34, %c0_35] : memref<1x64xf32, #tpu.memory_space<vmem>>, vector<1x64xf32>
    %44 = vector.broadcast %43 : vector<1x64xf32> to vector<8x64xf32>
    %45 = arith.addf %42, %44 : vector<8x64xf32>
    %c0_36 = arith.constant 0 : index
    %c0_37 = arith.constant 0 : index
    %46 = vector.load %arg14[%c0_36, %c0_37] : memref<8x64xf32, #tpu.memory_space<vmem>>, vector<8x64xf32>
    tpu.vector_store %arg14[%c0_36, %c0_37], %45 {strides = array<i32>} : memref<8x64xf32, #tpu.memory_space<vmem>>, vector<8x64xf32>,
    return
  }
  func.func @transform_0(%arg0: i32) -> (i32, i32) {
    %c0_i32 = arith.constant 0 : i32
    %c0_i32_0 = arith.constant 0 : i32
    return %arg0, %c0_i32 : i32, i32
  }
  func.func @transform_1(%arg0: i32) -> (i32, i32) {
    %c0_i32 = arith.constant 0 : i32
    %c0_i32_0 = arith.constant 0 : i32
    %c0_i32_1 = arith.constant 0 : i32
    return %c0_i32, %c0_i32_0 : i32, i32
  }
  func.func @transform_2(%arg0: i32) -> (i32, i32) {
    %c0_i32 = arith.constant 0 : i32
    %c0_i32_0 = arith.constant 0 : i32
    %c0_i32_1 = arith.constant 0 : i32
    return %c0_i32, %c0_i32_0 : i32, i32
  }
  func.func @transform_3(%arg0: i32) -> (i32, i32) {
    %c0_i32 = arith.constant 0 : i32
    %c0_i32_0 = arith.constant 0 : i32
    %c0_i32_1 = arith.constant 0 : i32
    return %c0_i32, %c0_i32_0 : i32, i32
  }
  func.func @transform_4(%arg0: i32) -> (i32, i32) {
    %c0_i32 = arith.constant 0 : i32
    %c0_i32_0 = arith.constant 0 : i32
    %c0_i32_1 = arith.constant 0 : i32
    return %c0_i32, %c0_i32_0 : i32, i32
  }
  func.func @transform_5(%arg0: i32) -> (i32, i32) {
    %c0_i32 = arith.constant 0 : i32
    %c0_i32_0 = arith.constant 0 : i32
    %c0_i32_1 = arith.constant 0 : i32
    return %c0_i32, %c0_i32_0 : i32, i32
  }
  func.func @transform_6(%arg0: i32) -> (i32, i32) {
    %c0_i32 = arith.constant 0 : i32
    %c0_i32_0 = arith.constant 0 : i32
    %c0_i32_1 = arith.constant 0 : i32
    return %c0_i32, %c0_i32_0 : i32, i32
  }
  func.func @transform_7(%arg0: i32) -> (i32, i32) {
    %c0_i32 = arith.constant 0 : i32
    %c0_i32_0 = arith.constant 0 : i32
    %c0_i32_1 = arith.constant 0 : i32
    return %c0_i32, %c0_i32_0 : i32, i32
  }
  func.func @transform_8(%arg0: i32) -> (i32, i32) {
    %c0_i32 = arith.constant 0 : i32
    %c0_i32_0 = arith.constant 0 : i32
    %c0_i32_1 = arith.constant 0 : i32
    return %c0_i32, %c0_i32_0 : i32, i32
  }
  func.func @transform_9(%arg0: i32) -> (i32, i32) {
    %c0_i32 = arith.constant 0 : i32
    %c0_i32_0 = arith.constant 0 : i32
    %c0_i32_1 = arith.constant 0 : i32
    return %c0_i32, %c0_i32_0 : i32, i32
  }
  func.func @transform_10(%arg0: i32) -> (i32, i32) {
    %c0_i32 = arith.constant 0 : i32
    %c0_i32_0 = arith.constant 0 : i32
    %c0_i32_1 = arith.constant 0 : i32
    return %c0_i32, %c0_i32_0 : i32, i32
  }
  func.func @transform_11(%arg0: i32) -> (i32, i32) {
    %c0_i32 = arith.constant 0 : i32
    %c0_i32_0 = arith.constant 0 : i32
    %c0_i32_1 = arith.constant 0 : i32
    return %c0_i32, %c0_i32_0 : i32, i32
  }
  func.func @transform_12(%arg0: i32) -> (i32, i32) {
    %c0_i32 = arith.constant 0 : i32
    %c0_i32_0 = arith.constant 0 : i32
    %c0_i32_1 = arith.constant 0 : i32
    return %c0_i32, %c0_i32_0 : i32, i32
  }
  func.func @transform_13(%arg0: i32) -> (i32, i32) {
    %c0_i32 = arith.constant 0 : i32
    %c0_i32_0 = arith.constant 0 : i32
    return %arg0, %c0_i32 : i32, i32
  }
  func.func @transform_14(%arg0: i32) -> (i32, i32) {
    %c0_i32 = arith.constant 0 : i32
    %c0_i32_0 = arith.constant 0 : i32
    return %arg0, %c0_i32 : i32, i32
  }
}

</mosaic_0001>

<bundles_post_ra>
// kernel: tpu_custom_call.1
= control target key start
LH: loop header
LB: loop body
LE: loop exit
PB: predicated region body
PF: predicated region fallthrough
CT: control target
= control target key end

     0   :  { %20 = vsyncpa [#allocation3], 0  ;;  %s2685_s0 = inlined_call_operand.hbm [shape: f32[8,64], index: 0, kind: input, shape index: {}]   ;;  %s2686_s1 = inlined_call_operand.vmem [shape: bf16[64,512], index: 1, kind: input, shape index: {}]   ;;  %s2687_s2 = inlined_call_operand.vmem [shape: f32[1,512], index: 2, kind: input, shape index: {}]   ;;  %s2688_s3 = inlined_call_operand.vmem [shape: bf16[512,128], index: 3, kind: input, shape index: {}]   ;;  %s2689_s4 = inlined_call_operand.vmem [shape: f32[1,128], index: 4, kind: input, shape index: {}]   ;;  %s2690_s5 = inlined_call_operand.vmem [shape: bf16[128,50], index: 5, kind: input, shape index: {}]   ;;  %s2691_s6 = inlined_call_operand.hbm [shape: f32[1,50], index: 6, kind: input, shape index: {}]   ;;  %s2692_s7 = inlined_call_operand.hbm [shape: bf16[50,128], index: 7, kind: input, shape index: {}]   ;;  %s2693_s8 = inlined_call_operand.hbm [shape: f32[1,128], index: 8, kind: input, shape index: {}]   ;;  %s2694_s9 = inlined_call_operand.hbm [shape: bf16[128,512], index: 9, kind: input, shape index: {}]   ;;  %s2695_s10 = inlined_call_operand.hbm [shape: f32[1,512], index: 10, kind: input, shape index: {}]   ;;  %s2696_s11 = inlined_call_operand.vmem [shape: bf16[512,64], index: 11, kind: input, shape index: {}]   ;;  %s2697_s12 = inlined_call_operand.vmem [shape: f32[1,64], index: 12, kind: input, shape index: {}]   ;;  %s2698_s13 = inlined_call_operand.hbm [shape: f32[8,64], index: 13, kind: output, shape index: {0}]   ;;  %s2699_s14 = inlined_call_operand.hbm [shape: f32[8,50], index: 14, kind: output, shape index: {1}]  }
   0x1   :  { %21 = vsyncpa [#allocation6], 0 }
   0x2   :  { %22 = vsyncpa [#allocation9], 0 }
   0x3   :  { %23 = vsyncpa [#allocation12], 0 }
   0x4   :  { %24 = vsyncpa [#allocation4], 0 }
   0x5   :  { %25 = vsyncpa [#allocation15], 0  ;;  %s2176_s29 = smov [#allocation5]   ;;  %s2177_s15 = smov [#allocation8]  }
   0x6   :  { %s52_s30 = sshll.u32 %s2176_s29, 4  ;;  %s74_s16 = sshll.u32 %s2177_s15, 4  ;;  %s53_s30 = int_to_ptr.vmem [resolvable:$true] %s52_s30  ;;  %s75_s16 = int_to_ptr.vmem [resolvable:$true] %s74_s16 }
   0x7   :  { %s1988_s19 = scalar_lea.hbm %s2691_s6, 16 }
   0x8   :  { %p1989_p0 = scmp.ne.s32.totalorder %s2691_s6, %s1988_s19  ;;  %p1992_p1 = scmp.lt.u32.totalorder %s1988_s19, %s2691_s6 }
   0xa   :  { %p1994_p2 = pnand %p1992_p1, %p1989_p0 }
   0xc   :  { %1997 = shalt.err (!%p1994_p2)
}
   0xd   :  { %s1998_s24 = scalar_lea.vmem %s53_s30, 16  ;;  %s2002_s25 = scalar_lea.vmem %s53_s30, 32 }
   0xe   :  { %p1999_p3 = scmp.ne.s32.totalorder %s53_s30, %s1998_s24  ;;  %p2003_p4 = scmp.lt.s32.totalorder %s53_s30, %s53_s30 }
   0xf   :  { %p2004_p5 = scmp.lt.s32.totalorder %s2002_s25, %s1998_s24 }
  0x11   :  { %p2005_p6 = por %p2004_p5, %p2003_p4 }
  0x13   :  { %p2006_p7 = pnand %p2005_p6, %p1999_p3 }
  0x15   :  { %2009 = shalt.err (!%p2006_p7)
}
  0x16   :  { %55 = dma.hbm_to_vmem [thread:$0]  %s2691_s6, 16, %s53_s30, [#allocation6]  }
  0x17   :  { %s2010_s15 = scalar_lea.hbm %s2693_s8, 16 }
  0x18   :  { %p2011_p8 = scmp.ne.s32.totalorder %s2693_s8, %s2010_s15  ;;  %p2014_p9 = scmp.lt.u32.totalorder %s2010_s15, %s2693_s8 }
  0x1a   :  { %p2016_p10 = pnand %p2014_p9, %p2011_p8 }
  0x1c   :  { %2019 = shalt.err (!%p2016_p10)
}
  0x1d   :  { %s2020_s21 = scalar_lea.vmem %s75_s16, 16  ;;  %s2024_s22 = scalar_lea.vmem %s75_s16, 32 }
  0x1e   :  { %p2021_p11 = scmp.ne.s32.totalorder %s75_s16, %s2020_s21  ;;  %p2025_p12 = scmp.lt.s32.totalorder %s75_s16, %s75_s16 }
  0x1f   :  { %p2026_p13 = scmp.lt.s32.totalorder %s2024_s22, %s2020_s21 }
  0x21   :  { %p2027_p0 = por %p2026_p13, %p2025_p12 }
  0x23   :  { %p2028_p1 = pnand %p2027_p0, %p2021_p11 }
  0x25   :  { %2031 = shalt.err (!%p2028_p1)
}
  0x26   :  { %77 = dma.hbm_to_vmem [thread:$0]  %s2693_s8, 16, %s75_s16, [#allocation9]  }
  0x27   :  { %s2178_s23 = smov [#allocation2]   ;;  %s2179_s25 = smov [#allocation7]  }
  0x28   :  { %s32_s24 = sshll.u32 %s2178_s23, 4  ;;  %s61_s26 = sshll.u32 %s2179_s25, 4  ;;  %s33_s24 = int_to_ptr.vmem [resolvable:$true] %s32_s24  ;;  %s2290_s26 = int_to_ptr.vmem [resolvable:$true] %s61_s26 }
  0x29   :  { %s2032_s29 = scalar_lea.hbm %s2685_s0, 128 }
  0x2a   :  { %p2033_p2 = scmp.ne.s32.totalorder %s2685_s0, %s2032_s29  ;;  %p2036_p3 = scmp.lt.u32.totalorder %s2032_s29, %s2685_s0 }
  0x2c   :  { %p2038_p4 = pnand %p2036_p3, %p2033_p2 }
  0x2e   :  { %2041 = shalt.err (!%p2038_p4)
}
  0x2f   :  { %s2042_s8 = scalar_lea.vmem %s33_s24, 128  ;;  %p2047_p6 = scmp.lt.s32.totalorder %s33_s24, %s33_s24 }
  0x30   :  { %p2043_p5 = scmp.ne.s32.totalorder %s33_s24, %s2042_s8  ;;  %p2048_p7 = scmp.lt.s32.totalorder %s2042_s8, %s2042_s8 }
  0x32   :  { %p2049_p8 = por %p2048_p7, %p2047_p6 }
  0x34   :  { %p2050_p9 = pnand %p2049_p8, %p2043_p5 }
  0x36   :  { %2053 = shalt.err (!%p2050_p9)
}
  0x37   :  { %35 = dma.hbm_to_vmem [thread:$0]  %s2685_s0, 128, %s33_s24, [#allocation3]  }
  0x38   :  { %s2054_s6 = scalar_lea.hbm %s2692_s7, 448 }
  0x39   :  { %p2055_p10 = scmp.ne.s32.totalorder %s2692_s7, %s2054_s6  ;;  %p2058_p11 = scmp.lt.u32.totalorder %s2054_s6, %s2692_s7 }
  0x3b   :  { %p2060_p12 = pnand %p2058_p11, %p2055_p10 }
  0x3d   :  { %2063 = shalt.err (!%p2060_p12)
}
  0x3e   :  { %s2064_s28 = scalar_lea.vmem %s2290_s26, 448  ;;  %p2069_p0 = scmp.lt.s32.totalorder %s2290_s26, %s2290_s26 }
  0x3f   :  { %p2065_p13 = scmp.ne.s32.totalorder %s2290_s26, %s2064_s28  ;;  %p2070_p1 = scmp.lt.s32.totalorder %s2064_s28, %s2064_s28 }
  0x41   :  { %p2071_p2 = por %p2070_p1, %p2069_p0 }
  0x43   :  { %p2072_p3 = pnand %p2071_p2, %p2065_p13 }
  0x45   :  { %2075 = shalt.err (!%p2072_p3)
}
  0x46   :  { %s2180_s0 = smov 64   ;;  %s2181_s24 = smov 4  }
  0x47   :  { %67 = dma.hbm_to_vmem [thread:$0]  %s2692_s7, 448, %s2290_s26, [#allocation6], %s2180_s0, %s2180_s0, %s2181_s24  }
  0x48   :  { %s2182_s17 = smov [#allocation10]   ;;  %s2076_s16 = scalar_lea.hbm %s2694_s9, 4096 }
  0x49   :  { %s83_s18 = sshll.u32 %s2182_s17, 4  ;;  %p2077_p4 = scmp.ne.s32.totalorder %s2694_s9, %s2076_s16  ;;  %s84_s18 = int_to_ptr.vmem [resolvable:$true] %s83_s18 }
  0x4a   :  { %p2080_p5 = scmp.lt.u32.totalorder %s2076_s16, %s2694_s9 }
  0x4c   :  { %p2082_p6 = pnand %p2080_p5, %p2077_p4 }
  0x4e   :  { %2085 = shalt.err (!%p2082_p6)
}
  0x4f   :  { %s2086_s30 = scalar_lea.vmem %s84_s18, 4096  ;;  %p2091_p8 = scmp.lt.s32.totalorder %s84_s18, %s84_s18 }
  0x50   :  { %p2087_p7 = scmp.ne.s32.totalorder %s84_s18, %s2086_s30  ;;  %p2092_p9 = scmp.lt.s32.totalorder %s2086_s30, %s2086_s30 }
  0x52   :  { %p2093_p10 = por %p2092_p9, %p2091_p8 }
  0x54   :  { %p2094_p11 = pnand %p2093_p10, %p2087_p7 }
  0x56   :  { %2097 = shalt.err (!%p2094_p11)
}
  0x57   :  { %s2183_s7 = smov 256   ;;  %s2184_s26 = smov 16  }
  0x58   :  { %89 = dma.hbm_to_vmem [thread:$0]  %s2694_s9, 4096, %s84_s18, [#allocation9], %s2183_s7, %s2183_s7, %s2184_s26  }
  0x59   :  { %s2185_s27 = smov [#allocation11]   ;;  %s2098_s29 = scalar_lea.hbm %s2695_s10, 64 }
  0x5a   :  { %s96_s28 = sshll.u32 %s2185_s27, 4  ;;  %p2099_p12 = scmp.ne.s32.totalorder %s2695_s10, %s2098_s29  ;;  %s97_s28 = int_to_ptr.vmem [resolvable:$true] %s96_s28 }
  0x5b   :  { %p2102_p13 = scmp.lt.u32.totalorder %s2098_s29, %s2695_s10 }
  0x5d   :  { %p2104_p0 = pnand %p2102_p13, %p2099_p12 }
  0x5f   :  { %2107 = shalt.err (!%p2104_p0)
}
  0x60   :  { %s2108_s16 = scalar_lea.vmem %s97_s28, 64  ;;  %p2113_p2 = scmp.lt.s32.totalorder %s97_s28, %s97_s28 }
  0x61   :  { %p2109_p1 = scmp.ne.s32.totalorder %s97_s28, %s2108_s16  ;;  %p2114_p3 = scmp.lt.s32.totalorder %s2108_s16, %s2108_s16 }
  0x63   :  { %p2115_p4 = por %p2114_p3, %p2113_p2 }
  0x65   :  { %p2116_p5 = pnand %p2115_p4, %p2109_p1 }
  0x67   :  { %2119 = shalt.err (!%p2116_p5)
}
  0x68   :  { %99 = dma.hbm_to_vmem [thread:$0]  %s2695_s10, 64, %s97_s28, [#allocation12]  }
  0x69   :  { %2164 = dma.done.wait [#allocation3], 128  }
  0x6a   :  { %2165 = vsyncadd [#allocation3], 4294967168 }
  0x6b   :  { %2166 = dma.done.wait [#allocation6], 464  }
  0x6c   :  { %2167 = vsyncadd [#allocation6], 4294966832 }
  0x6d   :  { %2168 = dma.done.wait [#allocation9], 4112  }
  0x6e   :  { %2169 = vsyncadd [#allocation9], 4294963184 }
  0x6f   :  { %2170 = dma.done.wait [#allocation12], 64  }
  0x70   :  { %2171 = vsyncadd [#allocation12], 4294967232  ;;  %v2186_v0 = vmov 0   ;;  %v1840_v1 = vld [vmem:[%s2686_s1 + $0x4] ss:$16 sps:$4 sm:$0xff]   ;;  %vm243_vm0 = vcmask 523264   ;;  %v143_v52 = vlaneseq }
  0x71   :  { %279 = vmatprep.mubr.bf16.mxu0 %v2186_v0  ;;  %320 = vmatprep.mubr.bf16.mxu1 %v2186_v0  ;;  %v1842_v2 = vld [vmem:[%s2686_s1 + $0xc] ss:$16 sps:$4 sm:$0xff]   ;;  %v1844_v3 = vld [vmem:[%s2686_s1] ss:$16 sps:$4 sm:$0xff]   ;;  %v1845_v4 = vld [vmem:[%s2686_s1 + $0x8] ss:$16 sps:$4 sm:$0xff]  }
  0x72   :  { %247 = vmatprep.subr.bf16.mxu0 %v1840_v1  ;;  %288 = vmatprep.subr.bf16.mxu1 %v1842_v2  ;;  %v1846_v5 = vld [vmem:[%s2686_s1 + $0x24] ss:$16 sps:$4 sm:$0xff]   ;;  %v1848_v6 = vld [vmem:[%s2686_s1 + $0x2c] ss:$16 sps:$4 sm:$0xff]   ;;  %v1850_v7 = vld [vmem:[%s2686_s1 + $0x20] ss:$16 sps:$4 sm:$0xff]  }
  0x73   :  { %248 = vmatpush1.bf16.msra.mxu0 %v1844_v3  ;;  %289 = vmatpush1.bf16.msra.mxu1 %v1845_v4  ;;  %v1851_v8 = vld [vmem:[%s2686_s1 + $0x28] ss:$16 sps:$4 sm:$0xff]   ;;  %v1852_v9 = vld [vmem:[%s2686_s1 + $0x44] ss:$16 sps:$4 sm:$0xff]   ;;  %v1854_v10 = vld [vmem:[%s2686_s1 + $0x4c] ss:$16 sps:$4 sm:$0xff]  }
  0x74   :  { %249 = vmatprep.subr.bf16.mxu0 %v1846_v5  ;;  %290 = vmatprep.subr.bf16.mxu1 %v1848_v6  ;;  %v1856_v11 = vld [vmem:[%s2686_s1 + $0x40] ss:$16 sps:$4 sm:$0xff]   ;;  %v1857_v12 = vld [vmem:[%s2686_s1 + $0x48] ss:$16 sps:$4 sm:$0xff]   ;;  %v1858_v13 = vld [vmem:[%s2686_s1 + $0x64] ss:$16 sps:$4 sm:$0xff]  }
  0x75   :  { %v1860_v14 = vld [vmem:[%s2686_s1 + $0x6c] ss:$16 sps:$4 sm:$0xff]   ;;  %v1862_v15 = vld [vmem:[%s2686_s1 + $0x60] ss:$16 sps:$4 sm:$0xff]   ;;  %v1863_v16 = vld [vmem:[%s2686_s1 + $0x68] ss:$16 sps:$4 sm:$0xff]  }
  0x76   :  { %v123_v17 = vld [vmem:[#allocation2] sm:$0xff]  ;;  %v1868_v23 = vld [vmem:[%s2688_s3 + $0x48] sm:$0xff]   ;;  %v1872_v27 = vld [vmem:[%s2688_s3 + $0x50] sm:$0xff]   ;;  %v2187_v51 = vmov 0.0   ;;  %v2495_v53 = vshrl.u32 %v143_v52, 7  ;;  %vm2188_vm1 = vmmov 0  }
  0x77   :  { %250 = vmatpush1.bf16.msra.mxu0 %v1850_v7  ;;  %291 = vmatpush1.bf16.msra.mxu1 %v1851_v8  ;;  %v1864_v18 = vld [vmem:[%s2688_s3 + $0x40] sm:$0xff]   ;;  %v124_v21 = vpack.c.bf16 %v123_v17, %v123_v17  ;;  %v1869_v24 = vld [vmem:[%s2688_s3 + $0xc8] sm:$0xff]   ;;  %v1873_v28 = vld [vmem:[%s2688_s3 + $0xd0] sm:$0xff]   ;;  %vm834_vm2 = vcmask 1040384   ;;  %vm793_vm3 = vcmask 408576  }
  0x78   :  { %251 = vmatprep.subr.bf16.mxu0 %v1852_v9  ;;  %292 = vmatprep.subr.bf16.mxu1 %v1854_v10  ;;  %v1865_v19 = vld [vmem:[%s2688_s3 + $0xc0] sm:$0xff]   ;;  %v1870_v25 = vld [vmem:[%s2688_s3 + $0x8] sm:$0xff]   ;;  %v1874_v29 = vld [vmem:[%s2688_s3 + $0x10] sm:$0xff]   ;;  %v145_v54 = vsub.s32 0, %v2495_v53  ;;  %v153_v55 = vsub.s32 2, %v2495_v53  ;;  %v149_v57 = vsub.s32 1, %v2495_v53 }
  0x79   :  { %v1866_v20 = vld [vmem:[%s2688_s3] sm:$0xff]   ;;  %v1871_v26 = vld [vmem:[%s2688_s3 + $0x88] sm:$0xff]   ;;  %v1875_v30 = vld [vmem:[%s2688_s3 + $0x90] sm:$0xff]   ;;  %v157_v58 = vsub.s32 3, %v2495_v53 }
  0x7a   :  { %v1867_v22 = vld [vmem:[%s2688_s3 + $0x80] sm:$0xff]   ;;  %v1876_v31 = vld [vmem:[%s2688_s3 + $0x58] sm:$0xff]   ;;  %v1884_v39 = vld [vmem:[%s2688_s3 + $0x68] sm:$0xff]  }
  0x7b   :  { %252 = vmatpush1.bf16.msra.mxu0 %v1856_v11  ;;  %293 = vmatpush1.bf16.msra.mxu1 %v1857_v12  ;;  %v1877_v32 = vld [vmem:[%s2688_s3 + $0xd8] sm:$0xff]   ;;  %v1880_v35 = vld [vmem:[%s2688_s3 + $0x60] sm:$0xff]   ;;  %v1885_v40 = vld [vmem:[%s2688_s3 + $0xe8] sm:$0xff]  }
  0x7c   :  { %253 = vmatprep.subr.bf16.mxu0 %v1858_v13  ;;  %294 = vmatprep.subr.bf16.mxu1 %v1860_v14  ;;  %v1878_v33 = vld [vmem:[%s2688_s3 + $0x18] sm:$0xff]   ;;  %v1881_v36 = vld [vmem:[%s2688_s3 + $0xe0] sm:$0xff]   ;;  %v1886_v41 = vld [vmem:[%s2688_s3 + $0x28] sm:$0xff]  }
  0x7d   :  { %v1879_v34 = vld [vmem:[%s2688_s3 + $0x98] sm:$0xff]   ;;  %v1882_v37 = vld [vmem:[%s2688_s3 + $0x20] sm:$0xff]   ;;  %v1887_v42 = vld [vmem:[%s2688_s3 + $0xa8] sm:$0xff]  }
  0x7e   :  { %v1883_v38 = vld [vmem:[%s2688_s3 + $0xa0] sm:$0xff]   ;;  %v1888_v43 = vld [vmem:[%s2688_s3 + $0x70] sm:$0xff]   ;;  %v1892_v47 = vld [vmem:[%s2688_s3 + $0x78] sm:$0xff]  }
  0x7f   :  { %254 = vmatpush1.bf16.msra.mxu0 %v1862_v15  ;;  %295 = vmatpush1.bf16.msra.mxu1 %v1863_v16  ;;  %v1889_v44 = vld [vmem:[%s2688_s3 + $0xf0] sm:$0xff]   ;;  %v1893_v48 = vld [vmem:[%s2688_s3 + $0xf8] sm:$0xff]   ;;  %v141_v56 = vld [vmem:[%s2687_s2] sm:$0xf] }
  0x80   :  { %1691 = vmatprep.subr.bf16.mxu0 %v1864_v18  ;;  %1713 = vmatprep.subr.bf16.mxu1 %v1865_v19  ;;  %v1890_v45 = vld [vmem:[%s2688_s3 + $0x30] sm:$0xff]   ;;  %v1894_v49 = vld [vmem:[%s2688_s3 + $0x38] sm:$0xff]   ;;  %v146_v59 = vrot.slane %v141_v56, %v145_v54  ;;  %v154_v60 = vrot.slane %v141_v56, %v153_v55  ;;  %v150_v61 = vrot.slane %v141_v56, %v149_v57  ;;  %v1896_v19 = vld [vmem:[%s2690_s5] sm:$0xff]  }
  0x81   :  { %v1891_v46 = vld [vmem:[%s2688_s3 + $0xb0] sm:$0xff]   ;;  %v1895_v50 = vld [vmem:[%s2688_s3 + $0xb8] sm:$0xff]   ;;  %v158_v62 = vrot.slane %v141_v56, %v157_v58 }
  0x82   :  { %1576 = vmatmul.mubr.msk.bf16.vlgmr.msra.gmra.mrb[0].mxu0 %vm243_vm0, %v124_v21  ;;  %1577 = vmatmul.mubr.msk.bf16.vlgmr.msra.gmra.mrb[0].mxu1 %vm243_vm0, %v124_v21  ;;  %v1897_v21 = vld [vmem:[%s2690_s5 + $0x8] sm:$0xff]   ;;  %v1917_v52 = vld [vmem:[#allocation10 + $0x28] ss:$16 sps:$4 sm:$0xff]   ;;  %v1925_v56 = vld [vmem:[#allocation10 + $0x4c] ss:$16 sps:$4 sm:$0xff]  }
  0x83   :  { %1692 = vmatpush3.bf16.msra.mxu0 %v1866_v20  ;;  %1714 = vmatpush3.bf16.msra.mxu1 %v1867_v22  ;;  %v1898_v22 = vld [vmem:[%s2690_s5 + $0x10] sm:$0xff]  }
  0x84   :  { %1693 = vmatprep.subr.bf16.mxu0 %v1868_v23  ;;  %1715 = vmatprep.subr.bf16.mxu1 %v1869_v24  ;;  %v1899_v23 = vld [vmem:[%s2690_s5 + $0x18] sm:$0xff]   ;;  %v1900_v24 = vld [vmem:[%s2690_s5 + $0x20] sm:$0xff]  }
  0x87   :  { %1694 = vmatpush3.bf16.msra.mxu0 %v1870_v25  ;;  %1716 = vmatpush3.bf16.msra.mxu1 %v1871_v26  ;;  %v1901_v25 = vld [vmem:[%s2690_s5 + $0x28] sm:$0xff]   ;;  %v1902_v26 = vld [vmem:[%s2690_s5 + $0x30] sm:$0xff]  }
  0x88   :  { %1695 = vmatprep.subr.bf16.mxu0 %v1872_v27  ;;  %1717 = vmatprep.subr.bf16.mxu1 %v1873_v28  ;;  %v1903_v27 = vld [vmem:[%s2690_s5 + $0x38] sm:$0xff]   ;;  %v1904_v28 = vld [vmem:[#allocation7] sm:$0xff]  }
  0x8b   :  { %1696 = vmatpush3.bf16.msra.mxu0 %v1874_v29  ;;  %1718 = vmatpush3.bf16.msra.mxu1 %v1875_v30  ;;  %v1905_v29 = vld [vmem:[#allocation7 + $0x8] sm:$0xff]   ;;  %v1906_v30 = vld [vmem:[#allocation7 + $0x10] sm:$0xff]  }
  0x8c   :  { %1697 = vmatprep.subr.bf16.mxu0 %v1876_v31  ;;  %1719 = vmatprep.subr.bf16.mxu1 %v1877_v32 }
  0x8f   :  { %1698 = vmatpush3.bf16.msra.mxu0 %v1878_v33  ;;  %1720 = vmatpush3.bf16.msra.mxu1 %v1879_v34  ;;  %v1578_v33 = vld [vmem:[%s2689_s4] ss:$0 sm:$0xff] }
  0x90   :  { %1699 = vmatprep.subr.bf16.mxu0 %v1880_v35  ;;  %1721 = vmatprep.subr.bf16.mxu1 %v1881_v36 }
  0x93   :  { %1700 = vmatpush3.bf16.msra.mxu0 %v1882_v37  ;;  %1722 = vmatpush3.bf16.msra.mxu1 %v1883_v38 }
  0x94   :  { %1701 = vmatprep.subr.bf16.mxu0 %v1884_v39  ;;  %1723 = vmatprep.subr.bf16.mxu1 %v1885_v40 }
  0x97   :  { %1702 = vmatpush3.bf16.msra.mxu0 %v1886_v41  ;;  %1724 = vmatpush3.bf16.msra.mxu1 %v1887_v42 }
  0x98   :  { %1703 = vmatprep.subr.bf16.mxu0 %v1888_v43  ;;  %1725 = vmatprep.subr.bf16.mxu1 %v1889_v44 }
  0x9b   :  { %1704 = vmatpush3.bf16.msra.mxu0 %v1890_v45  ;;  %1726 = vmatpush3.bf16.msra.mxu1 %v1891_v46  ;;  %v1907_v46 = vld [vmem:[#allocation7 + $0x18] ss:$0 sps:$4 sm:$0x11]  }
  0x9c   :  { %1705 = vmatprep.subr.bf16.mxu0 %v1892_v47  ;;  %1727 = vmatprep.subr.bf16.mxu1 %v1893_v48  ;;  %v836_v47 = vsel %vm834_vm2, %v1907_v46, 0  ;;  %v1910_v48 = vld [vmem:[#allocation10 + $0x4] ss:$16 sps:$4 sm:$0xff]   ;;  %v1966_v46 = vld [vmem:[%s2696_s11 + $0x10] sm:$0xff]  }
  0x9f   :  { %1706 = vmatpush3.bf16.msra.mxu0 %v1894_v49  ;;  %1728 = vmatpush3.bf16.msra.mxu1 %v1895_v50  ;;  %v1911_v49 = vld [vmem:[#allocation10 + $0x8] ss:$16 sps:$4 sm:$0xff]   ;;  %v1913_v50 = vld [vmem:[#allocation10 + $0xc] ss:$16 sps:$4 sm:$0xff]  }
  0xa0   :  { %1793 = vmatprep.subr.bf16.mxu0 %v2187_v51  ;;  %1813 = vmatprep.subr.bf16.mxu1 %v2187_v51 }
 0x155   :  { %v281_v63 = vpop.f32.mrb[0].mxu0  ;;  %v322_v1 = vpop.f32.mrb[0].mxu1 }
 0x156   :  { %v282_v2 = vadd.f32 %v281_v63, %v146_v59  ;;  %v323_v3 = vadd.f32 %v322_v1, %v154_v60  ;;  %v283_v4 = vpop.f32.mrb[1].mxu0  ;;  %v324_v5 = vpop.f32.mrb[1].mxu1  ;;  %v1923_v59 = vld [vmem:[#allocation10 + $0x48] ss:$16 sps:$4 sm:$0xff]   ;;  %v1931_v60 = vld [vmem:[#allocation10 + $0x6c] ss:$16 sps:$4 sm:$0xff]  }
 0x157   :  { %v284_v6 = vadd.f32 %v283_v4, %v150_v61  ;;  %v325_v7 = vadd.f32 %v324_v5, %v158_v62  ;;  %v285_v8 = vpop.f32.mrb[2].mxu0  ;;  %v326_v9 = vpop.f32.mrb[2].mxu1  ;;  %v1929_v61 = vld [vmem:[#allocation10 + $0x68] ss:$16 sps:$4 sm:$0xff]   ;;  %v1937_v62 = vld [vmem:[#allocation10 + $0x8c] ss:$16 sps:$4 sm:$0xff]  }
 0x158   :  { %v329_v10 = vmax.f32 %v282_v2, 0.0  ;;  %v331_v11 = vmax.f32 %v323_v3, 0.0  ;;  %v286_v12 = vpop.f32.mrb[3].mxu0  ;;  %v327_v13 = vpop.f32.mrb[3].mxu1  ;;  %v1935_v63 = vld [vmem:[#allocation10 + $0x88] ss:$16 sps:$4 sm:$0xff]  }
 0x159   :  { %v330_v14 = vmax.f32 %v284_v6, 0.0  ;;  %v332_v15 = vmax.f32 %v325_v7, 0.0  ;;  %v1943_v1 = vld [vmem:[#allocation10 + $0xac] ss:$16 sps:$4 sm:$0xff]   ;;  %v1941_v2 = vld [vmem:[#allocation10 + $0xa8] ss:$16 sps:$4 sm:$0xff]  }
 0x15a   :  { %v335_v16 = vpack.c.bf16 %v331_v11, %v331_v11  ;;  %v333_v20 = vpack.c.bf16 %v329_v10, %v329_v10  ;;  %v1949_v3 = vld [vmem:[#allocation10 + $0xcc] ss:$16 sps:$4 sm:$0xff]   ;;  %v1947_v4 = vld [vmem:[#allocation10 + $0xc8] ss:$16 sps:$4 sm:$0xff]   ;;  %v1611_v5 = vld [vmem:[#allocation5] ss:$0 sm:$0xff] }
 0x15b   :  { %v334_v17 = vpack.c.bf16 %v330_v14, %v330_v14  ;;  %v336_v18 = vpack.c.bf16 %v332_v15, %v332_v15  ;;  %v1908_v10 = vld [vmem:[#allocation10] ss:$16 sps:$4 sm:$0xff]   ;;  %v1916_v13 = vld [vmem:[#allocation10 + $0x24] ss:$16 sps:$4 sm:$0xff]  }
 0x15c   :  { %v1914_v14 = vld [vmem:[#allocation10 + $0x20] ss:$16 sps:$4 sm:$0xff]   ;;  %v1922_v15 = vld [vmem:[#allocation10 + $0x44] ss:$16 sps:$4 sm:$0xff]  }
 0x15d   :  { %632 = vmatprep.mubr.bf16.mxu0 %v334_v17  ;;  %672 = vmatprep.mubr.bf16.mxu1 %v336_v18  ;;  %v1928_v17 = vld [vmem:[#allocation10 + $0x64] ss:$16 sps:$4 sm:$0xff]   ;;  %v1926_v18 = vld [vmem:[#allocation10 + $0x60] ss:$16 sps:$4 sm:$0xff]  }
 0x15e   :  { %633 = vmatmul.mubr.bf16.vlgmr.msra.gmra.mrb[4].mxu0 %v333_v20  ;;  %673 = vmatmul.mubr.bf16.vlgmr.msra.gmra.mrb[4].mxu1 %v335_v16  ;;  %v1920_v16 = vld [vmem:[#allocation10 + $0x40] ss:$16 sps:$4 sm:$0xff]  }
 0x15f   :  { %1794 = vmatpush3.bf16.msra.mxu0 %v1896_v19  ;;  %1809 = vmatprep.mubr.msk.bf16.mxu0 %vm2188_vm1, %v2187_v51  ;;  %v1934_v19 = vld [vmem:[#allocation10 + $0x84] ss:$16 sps:$4 sm:$0xff]   ;;  %v1932_v20 = vld [vmem:[#allocation10 + $0x80] ss:$16 sps:$4 sm:$0xff]  }
 0x160   :  { %1795 = vmatprep.subr.bf16.mxu0 %v2187_v51  ;;  %1821 = vmatprep.mubr.msk.bf16.mxu1 %vm2188_vm1, %v2187_v51 }
 0x161   :  { %1814 = vmatpush3.bf16.msra.mxu1 %v1904_v28  ;;  %v1956_v28 = vld [vmem:[%s2696_s11 + $0x40] sm:$0xff]  }
 0x162   :  { %1815 = vmatprep.subr.bf16.mxu1 %v2187_v51 }
 0x163   :  { %1796 = vmatpush3.bf16.msra.mxu0 %v1897_v21  ;;  %v1940_v21 = vld [vmem:[#allocation10 + $0xa4] ss:$16 sps:$4 sm:$0xff]  }
 0x164   :  { %1797 = vmatprep.subr.bf16.mxu0 %v2187_v51 }
 0x165   :  { %1816 = vmatpush3.bf16.msra.mxu1 %v1905_v29  ;;  %v1957_v29 = vld [vmem:[%s2696_s11 + $0xc0] sm:$0xff]  }
 0x166   :  { %1817 = vmatprep.subr.bf16.mxu1 %v2187_v51 }
 0x167   :  { %1798 = vmatpush3.bf16.msra.mxu0 %v1898_v22  ;;  %v1938_v22 = vld [vmem:[#allocation10 + $0xa0] ss:$16 sps:$4 sm:$0xff]  }
 0x168   :  { %1799 = vmatprep.subr.bf16.mxu0 %v2187_v51 }
 0x169   :  { %1818 = vmatpush3.bf16.msra.mxu1 %v1906_v30  ;;  %v1620_v30 = vld [vmem:[#allocation8] ss:$0 sm:$0xff] }
 0x16a   :  { %1819 = vmatprep.subr.bf16.mxu1 %v2187_v51 }
 0x16b   :  { %1800 = vmatpush3.bf16.msra.mxu0 %v1899_v23  ;;  %v1946_v23 = vld [vmem:[#allocation10 + $0xc4] ss:$16 sps:$4 sm:$0xff]  }
 0x16c   :  { %1801 = vmatprep.subr.bf16.mxu0 %v2187_v51 }
 0x16d   :  { %1820 = vmatpush3.bf16.msra.mxu1 %v836_v47  ;;  %v1967_v47 = vld [vmem:[%s2696_s11 + $0x90] sm:$0xff]  }
 0x16e   :  { %1094 = vmatprep.subr.bf16.mxu1 %v1910_v48  ;;  %v1968_v48 = vld [vmem:[%s2696_s11 + $0x58] sm:$0xff]  }
 0x16f   :  { %1802 = vmatpush3.bf16.msra.mxu0 %v1900_v24  ;;  %v1952_v24 = vld [vmem:[#allocation10 + $0xe4] ss:$16 sps:$4 sm:$0xff]  }
 0x170   :  { %1803 = vmatprep.subr.bf16.mxu0 %v2187_v51 }
 0x173   :  { %1804 = vmatpush3.bf16.msra.mxu0 %v1901_v25  ;;  %v1955_v25 = vld [vmem:[#allocation10 + $0xec] ss:$16 sps:$4 sm:$0xff]  }
 0x174   :  { %1805 = vmatprep.subr.bf16.mxu0 %v2187_v51 }
 0x177   :  { %1806 = vmatpush3.bf16.msra.mxu0 %v1902_v26  ;;  %v1950_v26 = vld [vmem:[#allocation10 + $0xe0] ss:$16 sps:$4 sm:$0xff]  }
 0x178   :  { %1807 = vmatprep.subr.bf16.mxu0 %v2187_v51  ;;  %v1919_v51 = vld [vmem:[#allocation10 + $0x2c] ss:$16 sps:$4 sm:$0xff]  }
 0x17b   :  { %1808 = vmatpush3.bf16.msra.mxu0 %v1903_v27  ;;  %v1953_v27 = vld [vmem:[#allocation10 + $0xe8] ss:$16 sps:$4 sm:$0xff]  }
 0x17c   :  { %1135 = vmatprep.subr.bf16.mxu0 %v1913_v50  ;;  %v1970_v50 = vld [vmem:[%s2696_s11 + $0x18] sm:$0xff]  }
 0x231   :  { %v1707_v31 = vpop.f32.mrb[4].mxu0  ;;  %v1729_v32 = vpop.f32.mrb[4].mxu1 }
 0x232   :  { %v1708_v34 = vpop.f32.mrb[5].mxu0  ;;  %v1730_v35 = vpop.f32.mrb[5].mxu1 }
 0x233   :  { %v1709_v36 = vadd.f32 %v1708_v34, %v1707_v31  ;;  %v1731_v37 = vadd.f32 %v1730_v35, %v1729_v32  ;;  %v1710_v38 = vpop.f32.mrb[6].mxu0  ;;  %v1732_v39 = vpop.f32.mrb[6].mxu1 }
 0x234   :  { %v1711_v40 = vpop.f32.mrb[7].mxu0  ;;  %v1733_v41 = vpop.f32.mrb[7].mxu1  ;;  %v1959_v38 = vld [vmem:[%s2696_s11 + $0x80] sm:$0xff]  }
 0x235   :  { %v635_v42 = vadd.f32 %v1709_v36, %v1578_v33  ;;  %v1960_v40 = vld [vmem:[%s2696_s11 + $0x48] sm:$0xff]  }
 0x236   :  { %v1961_v41 = vld [vmem:[%s2696_s11 + $0xc8] sm:$0xff]  }
 0x237   :  { %v675_v43 = vadd.f32 %v1731_v37, %v635_v42  ;;  %v1958_v37 = vld [vmem:[%s2696_s11] sm:$0xff]   ;;  %v1962_v42 = vld [vmem:[%s2696_s11 + $0x8] sm:$0xff]  }
 0x239   :  { %v680_v44 = vmax.f32 %v675_v43, 0.0  ;;  %v1963_v43 = vld [vmem:[%s2696_s11 + $0x88] sm:$0xff]  }
 0x23b   :  { %v681_v45 = vpack.c.bf16 %v680_v44, %v680_v44  ;;  %v1964_v44 = vld [vmem:[%s2696_s11 + $0x50] sm:$0xff]  }
 0x23d   :  { %1810 = vmatmul.mubr.bf16.vlgmr.msra.gmra.mrb[8].mxu0 %v681_v45  ;;  %v1965_v45 = vld [vmem:[%s2696_s11 + $0xd0] sm:$0xff]  }
 0x23e   :  { %1167 = vmatprep.mubr.bf16.mxu0 %v2186_v0  ;;  %1136 = vmatpush1.bf16.msra.mxu0 %v1911_v49  ;;  %v1969_v49 = vld [vmem:[%s2696_s11 + $0xd8] sm:$0xff]  }
 0x23f   :  { %1137 = vmatprep.subr.bf16.mxu0 %v1919_v51  ;;  %v1971_v51 = vld [vmem:[%s2696_s11 + $0x98] sm:$0xff]  }
 0x242   :  { %1138 = vmatpush1.bf16.msra.mxu0 %v1917_v52  ;;  %v1972_v52 = vld [vmem:[%s2696_s11 + $0x60] sm:$0xff]  }
 0x243   :  { %1139 = vmatprep.subr.bf16.mxu0 %v1925_v56  ;;  %v1973_v56 = vld [vmem:[%s2696_s11 + $0xe0] sm:$0xff]  }
 0x246   :  { %1140 = vmatpush1.bf16.msra.mxu0 %v1923_v59  ;;  %v1974_v59 = vld [vmem:[%s2696_s11 + $0x20] sm:$0xff]  }
 0x247   :  { %1141 = vmatprep.subr.bf16.mxu0 %v1931_v60  ;;  %v1975_v60 = vld [vmem:[%s2696_s11 + $0xa0] sm:$0xff]  }
 0x24a   :  { %1142 = vmatpush1.bf16.msra.mxu0 %v1929_v61  ;;  %v1976_v61 = vld [vmem:[%s2696_s11 + $0x68] sm:$0xff]  }
 0x24b   :  { %1143 = vmatprep.subr.bf16.mxu0 %v1937_v62  ;;  %v1977_v62 = vld [vmem:[%s2696_s11 + $0xe8] sm:$0xff]  }
 0x24e   :  { %1144 = vmatpush1.bf16.msra.mxu0 %v1935_v63  ;;  %v1978_v63 = vld [vmem:[%s2696_s11 + $0x28] sm:$0xff]  }
 0x24f   :  { %1145 = vmatprep.subr.bf16.mxu0 %v1943_v1  ;;  %v1979_v1 = vld [vmem:[%s2696_s11 + $0xa8] sm:$0xff]  }
 0x252   :  { %1146 = vmatpush1.bf16.msra.mxu0 %v1941_v2  ;;  %v1980_v2 = vld [vmem:[%s2696_s11 + $0x70] sm:$0xff]  }
 0x253   :  { %1147 = vmatprep.subr.bf16.mxu0 %v1949_v3  ;;  %v1981_v3 = vld [vmem:[%s2696_s11 + $0xf0] sm:$0xff]  }
 0x256   :  { %1148 = vmatpush1.bf16.msra.mxu0 %v1947_v4  ;;  %v1982_v4 = vld [vmem:[%s2696_s11 + $0x30] sm:$0xff]  }
 0x257   :  { %1149 = vmatprep.subr.bf16.mxu0 %v1955_v25 }
 0x25a   :  { %1150 = vmatpush1.bf16.msra.mxu0 %v1953_v27 }
 0x25b   :  { %1771 = vmatprep.subr.bf16.mxu0 %v1957_v29 }
 0x310   :  { %v787_v6 = vpop.f32.mrb[8].mxu0 }
 0x311   :  { %v788_v7 = vadd.f32 %v1611_v5, %v787_v6  ;;  %v1811_v8 = vpop.f32.mrb[9].mxu0  ;;  %v1983_v5 = vld [vmem:[%s2696_s11 + $0xb0] sm:$0xff]   ;;  %v1984_v6 = vld [vmem:[%s2696_s11 + $0x78] sm:$0xff]  }
 0x312   :  { %v790_v9 = vpop.f32.mrb[10].mxu0  ;;  %v1986_v8 = vld [vmem:[%s2696_s11 + $0x38] sm:$0xff]  }
 0x313   :  { %v795_v11 = vpack.c.bf16 %v788_v7, %v788_v7  ;;  %v1812_v12 = vpop.f32.mrb[11].mxu0  ;;  %794 = vst.msk [vmem:[#allocation14] sm:$0xff] %vm793_vm3, %v788_v7  ;;  %v1985_v7 = vld [vmem:[%s2696_s11 + $0xf8] sm:$0xff]  }
 0x314   :  { %v1987_v9 = vld [vmem:[%s2696_s11 + $0xb8] sm:$0xff]   ;;  %s2189_s11 = smov [#allocation14]  }
 0x315   :  { %1822 = vmatmul.mubr.msk.bf16.vlgmr.msra.gmra.mrb[8].mxu1 %vm793_vm3, %v795_v11  ;;  %s1544_s3 = sshll.u32 %s2189_s11, 4  ;;  %s1545_s3 = int_to_ptr.vmem [resolvable:$true] %s1544_s3 }
 0x316   :  { %1095 = vmatpush1.bf16.msra.mxu1 %v1908_v10  ;;  %1126 = vmatprep.mubr.bf16.mxu1 %v2186_v0  ;;  %v1944_v0 = vld [vmem:[#allocation10 + $0xc0] ss:$16 sps:$4 sm:$0xff]   ;;  %s2120_s26 = scalar_lea.vmem %s1545_s3, 128  ;;  %p2125_p7 = scmp.lt.s32.totalorder %s1545_s3, %s1545_s3 }
 0x317   :  { %1096 = vmatprep.subr.bf16.mxu1 %v1916_v13  ;;  %v912_v10 = vld [vmem:[#allocation11] sm:$0xf]  ;;  %p2121_p6 = scmp.ne.s32.totalorder %s1545_s3, %s2120_s26  ;;  %p2126_p8 = scmp.lt.s32.totalorder %s2120_s26, %s2120_s26 }
 0x318   :  { %v917_v11 = vrot.slane %v912_v10, %v145_v54  ;;  %v925_v12 = vrot.slane %v912_v10, %v153_v55  ;;  %v921_v13 = vrot.slane %v912_v10, %v149_v57 }
 0x319   :  { %p2127_p9 = por %p2126_p8, %p2125_p7 }
 0x31a   :  { %1097 = vmatpush1.bf16.msra.mxu1 %v1914_v14  ;;  %v929_v14 = vrot.slane %v912_v10, %v157_v58 }
 0x31b   :  { %1098 = vmatprep.subr.bf16.mxu1 %v1922_v15  ;;  %p2128_p10 = pnand %p2127_p9, %p2121_p6 }
 0x31e   :  { %1099 = vmatpush1.bf16.msra.mxu1 %v1920_v16 }
 0x31f   :  { %1100 = vmatprep.subr.bf16.mxu1 %v1928_v17 }
 0x322   :  { %1101 = vmatpush1.bf16.msra.mxu1 %v1926_v18 }
 0x323   :  { %1102 = vmatprep.subr.bf16.mxu1 %v1934_v19 }
 0x326   :  { %1103 = vmatpush1.bf16.msra.mxu1 %v1932_v20 }
 0x327   :  { %1104 = vmatprep.subr.bf16.mxu1 %v1940_v21 }
 0x32a   :  { %1105 = vmatpush1.bf16.msra.mxu1 %v1938_v22 }
 0x32b   :  { %1106 = vmatprep.subr.bf16.mxu1 %v1946_v23 }
 0x32e   :  { %1107 = vmatpush1.bf16.msra.mxu1 %v1944_v0 }
 0x32f   :  { %1108 = vmatprep.subr.bf16.mxu1 %v1952_v24 }
 0x332   :  { %1109 = vmatpush1.bf16.msra.mxu1 %v1950_v26 }
 0x333   :  { %1749 = vmatprep.subr.bf16.mxu1 %v1956_v28 }
 0x3e8   :  { %v872_v31 = vpop.f32.mrb[8].mxu1 }
 0x3e9   :  { %v873_v32 = vadd.f32 %v1620_v30, %v872_v31  ;;  %v1823_v33 = vpop.f32.mrb[9].mxu1 }
 0x3ea   :  { %v875_v34 = vpop.f32.mrb[10].mxu1 }
 0x3eb   :  { %v878_v35 = vmax.f32 %v873_v32, 0.0  ;;  %v1824_v36 = vpop.f32.mrb[11].mxu1 }
 0x3ed   :  { %v879_v39 = vpack.c.bf16 %v878_v35, %v878_v35 }
 0x3ef   :  { %1127 = vmatmul.mubr.bf16.vlgmr.msra.gmra.mrb[12].mxu1 %v879_v39  ;;  %1168 = vmatmul.mubr.bf16.vlgmr.msra.gmra.mrb[12].mxu0 %v879_v39 }
 0x3f0   :  { %1750 = vmatpush3.bf16.msra.mxu1 %v1958_v37  ;;  %1772 = vmatpush3.bf16.msra.mxu0 %v1959_v38 }
 0x3f1   :  { %1751 = vmatprep.subr.bf16.mxu1 %v1960_v40  ;;  %1773 = vmatprep.subr.bf16.mxu0 %v1961_v41 }
 0x3f4   :  { %1752 = vmatpush3.bf16.msra.mxu1 %v1962_v42  ;;  %1774 = vmatpush3.bf16.msra.mxu0 %v1963_v43 }
 0x3f5   :  { %1753 = vmatprep.subr.bf16.mxu1 %v1964_v44  ;;  %1775 = vmatprep.subr.bf16.mxu0 %v1965_v45 }
 0x3f8   :  { %1754 = vmatpush3.bf16.msra.mxu1 %v1966_v46  ;;  %1776 = vmatpush3.bf16.msra.mxu0 %v1967_v47 }
 0x3f9   :  { %1755 = vmatprep.subr.bf16.mxu1 %v1968_v48  ;;  %1777 = vmatprep.subr.bf16.mxu0 %v1969_v49 }
 0x3fc   :  { %1756 = vmatpush3.bf16.msra.mxu1 %v1970_v50  ;;  %1778 = vmatpush3.bf16.msra.mxu0 %v1971_v51 }
 0x3fd   :  { %1757 = vmatprep.subr.bf16.mxu1 %v1972_v52  ;;  %1779 = vmatprep.subr.bf16.mxu0 %v1973_v56 }
 0x400   :  { %1758 = vmatpush3.bf16.msra.mxu1 %v1974_v59  ;;  %1780 = vmatpush3.bf16.msra.mxu0 %v1975_v60 }
 0x401   :  { %1759 = vmatprep.subr.bf16.mxu1 %v1976_v61  ;;  %1781 = vmatprep.subr.bf16.mxu0 %v1977_v62 }
 0x404   :  { %1760 = vmatpush3.bf16.msra.mxu1 %v1978_v63  ;;  %1782 = vmatpush3.bf16.msra.mxu0 %v1979_v1 }
 0x405   :  { %1761 = vmatprep.subr.bf16.mxu1 %v1980_v2  ;;  %1783 = vmatprep.subr.bf16.mxu0 %v1981_v3 }
 0x408   :  { %1762 = vmatpush3.bf16.msra.mxu1 %v1982_v4  ;;  %1784 = vmatpush3.bf16.msra.mxu0 %v1983_v5 }
 0x409   :  { %1763 = vmatprep.subr.bf16.mxu1 %v1984_v6  ;;  %1785 = vmatprep.subr.bf16.mxu0 %v1985_v7 }
 0x40c   :  { %1764 = vmatpush3.bf16.msra.mxu1 %v1986_v8  ;;  %1786 = vmatpush3.bf16.msra.mxu0 %v1987_v9 }
 0x4c2   :  { %v1128_v15 = vpop.f32.mrb[12].mxu1  ;;  %v1169_v16 = vpop.f32.mrb[12].mxu0 }
 0x4c3   :  { %v1129_v17 = vadd.f32 %v1128_v15, %v917_v11  ;;  %v1170_v18 = vadd.f32 %v1169_v16, %v925_v12  ;;  %v1130_v19 = vpop.f32.mrb[13].mxu1  ;;  %v1171_v20 = vpop.f32.mrb[13].mxu0 }
 0x4c4   :  { %v1131_v21 = vadd.f32 %v1130_v19, %v921_v13  ;;  %v1172_v22 = vadd.f32 %v1171_v20, %v929_v14  ;;  %v1132_v23 = vpop.f32.mrb[14].mxu1  ;;  %v1173_v0 = vpop.f32.mrb[14].mxu0 }
 0x4c5   :  { %v1176_v54 = vmax.f32 %v1129_v17, 0.0  ;;  %v1178_v24 = vmax.f32 %v1170_v18, 0.0  ;;  %v1133_v25 = vpop.f32.mrb[15].mxu1  ;;  %v1174_v55 = vpop.f32.mrb[15].mxu0 }
 0x4c6   :  { %v1177_v26 = vmax.f32 %v1131_v21, 0.0  ;;  %v1179_v27 = vmax.f32 %v1172_v22, 0.0 }
 0x4c7   :  { %v1180_v53 = vpack.c.bf16 %v1176_v54, %v1176_v54  ;;  %v1182_v58 = vpack.c.bf16 %v1178_v24, %v1178_v24 }
 0x4c8   :  { %v1181_v57 = vpack.c.bf16 %v1177_v26, %v1177_v26  ;;  %v1183_v28 = vpack.c.bf16 %v1179_v27, %v1179_v27 }
 0x4ca   :  { %1479 = vmatprep.mubr.bf16.mxu1 %v1181_v57  ;;  %1519 = vmatprep.mubr.bf16.mxu0 %v1183_v28 }
 0x4cb   :  { %1480 = vmatmul.mubr.bf16.vlgmr.msra.gmra.mrb[16].mxu1 %v1180_v53  ;;  %1520 = vmatmul.mubr.bf16.vlgmr.msra.gmra.mrb[16].mxu0 %v1182_v58 }
 0x4cc   :  { %2131 = shalt.err (!%p2128_p10)
}
 0x4cd   :  { %s2132_s27 = scalar_lea.hbm %s2699_s14, 128 }
 0x4ce   :  { %p2133_p11 = scmp.ne.s32.totalorder %s2699_s14, %s2132_s27  ;;  %p2136_p12 = scmp.lt.u32.totalorder %s2132_s27, %s2699_s14 }
 0x4d0   :  { %p2138_p13 = pnand %p2136_p12, %p2133_p11 }
 0x4d2   :  { %2141 = shalt.err (!%p2138_p13)
}
 0x4d3   :  { %1547 = dma.vmem_to_hbm [thread:$0]  %s1545_s3, 128, %s2699_s14, [#allocation15]   ;;  %v1658_v31 = vld [vmem:[%s2697_s12] ss:$0 sm:$0xff] }
 0x4d4   :  { %s2190_s8 = smov [#allocation13]  }
 0x4d5   :  { %s1534_s16 = sshll.u32 %s2190_s8, 4  ;;  %s1535_s16 = int_to_ptr.vmem [resolvable:$true] %s1534_s16 }
 0x4d6   :  { %s2142_s14 = scalar_lea.vmem %s1535_s16, 128  ;;  %p2147_p1 = scmp.lt.s32.totalorder %s1535_s16, %s1535_s16 }
 0x4d7   :  { %p2143_p0 = scmp.ne.s32.totalorder %s1535_s16, %s2142_s14  ;;  %p2148_p2 = scmp.lt.s32.totalorder %s2142_s14, %s2142_s14 }
 0x4d9   :  { %p2149_p3 = por %p2148_p2, %p2147_p1 }
 0x4db   :  { %p2150_p4 = pnand %p2149_p3, %p2143_p0 }
 0x59e   :  { %v1765_v29 = vpop.f32.mrb[16].mxu1  ;;  %v1787_v30 = vpop.f32.mrb[16].mxu0 }
 0x59f   :  { %v1766_v32 = vpop.f32.mrb[17].mxu1  ;;  %v1788_v33 = vpop.f32.mrb[17].mxu0 }
 0x5a0   :  { %v1767_v34 = vadd.f32 %v1766_v32, %v1765_v29  ;;  %v1789_v35 = vadd.f32 %v1788_v33, %v1787_v30  ;;  %v1768_v36 = vpop.f32.mrb[18].mxu1  ;;  %v1790_v37 = vpop.f32.mrb[18].mxu0 }
 0x5a1   :  { %v1769_v38 = vpop.f32.mrb[19].mxu1  ;;  %v1791_v39 = vpop.f32.mrb[19].mxu0 }
 0x5a2   :  { %v1482_v40 = vadd.f32 %v1767_v34, %v1658_v31 }
 0x5a4   :  { %v1522_v41 = vadd.f32 %v1789_v35, %v1482_v40 }
 0x5a6   :  { %1527 = vst.msk [vmem:[#allocation13] sm:$0xff] %vm243_vm0, %v1522_v41 }
 0x5a7   :  { %2153 = shalt.err (!%p2150_p4)
}
 0x5a8   :  { %s2154_s9 = scalar_lea.hbm %s2698_s13, 128 }
 0x5a9   :  { %p2155_p5 = scmp.ne.s32.totalorder %s2698_s13, %s2154_s9  ;;  %p2158_p6 = scmp.lt.u32.totalorder %s2154_s9, %s2698_s13 }
 0x5ab   :  { %p2160_p7 = pnand %p2158_p6, %p2155_p5 }
 0x5ad   :  { %2163 = shalt.err (!%p2160_p7)
}
 0x5ae   :  { %1537 = dma.vmem_to_hbm [thread:$0]  %s1535_s16, 128, %s2698_s13, [#allocation4]  }
 0x5af   :  { %2172 = dma.done.wait [#allocation4], 128  }
 0x5b0   :  { %2173 = vsyncadd [#allocation4], 4294967168 }
 0x5b1   :  { %2174 = dma.done.wait [#allocation15], 128  }
 0x5b2   :  { %2175 = vsyncadd [#allocation15], 4294967168 }
 0x5b3   :  { %1554 = vsyncpa [#allocation3], 1 }
 0x5b4   :  { %1555 = vsyncpa [#allocation6], 1 }
 0x5b5   :  { %1556 = vsyncpa [#allocation9], 1 }
 0x5b6   :  { %1557 = vsyncpa [#allocation12], 1 }
 0x5b7   :  { %1558 = vsyncpa [#allocation4], 1 }
 0x5b8   :  { %1559 = vsyncpa [#allocation15], 1 }

</bundles_post_ra>
